<compile_context>
chip_gen: v6e
topology: v6e:2x2x1
jax: 0.10.0
libtpu: 0.0.40
codegen_flags: <defaults>
</compile_context>

<pallas_src>
import math
import functools

import jax
import jax.numpy as jnp
from jax.experimental import pallas as pl
from jax.experimental.pallas import tpu as pltpu


# ----------------------------------------------------------------------------
# GELU (tanh approximation — Mosaic-safe: tanh/mul/add only)
# ----------------------------------------------------------------------------
def _gelu_tanh(x):
    c = math.sqrt(2.0 / math.pi)
    return 0.5 * x * (1.0 + jnp.tanh(c * (x + 0.044715 * x * x * x)))


def _round_up(v, m):
    return ((v + m - 1) // m) * m


# ----------------------------------------------------------------------------
# Kernel factory — specialized at trace time on (has_proj, use_mask)
# ----------------------------------------------------------------------------
def _make_kernel(has_proj, use_mask, fout):
    def kernel(*refs):
        if use_mask:
            (a_ref, xk_ref, xr_ref, invdeg_ref, wl_ref, wcat_ref, bcat_ref,
             mask_ref, o_ref, acc_ref) = refs
        else:
            (a_ref, xk_ref, xr_ref, invdeg_ref, wl_ref, wcat_ref, bcat_ref,
             o_ref, acc_ref) = refs
            mask_ref = None

        k = pl.program_id(1)

        @pl.when(k == 0)
        def _():
            acc_ref[...] = jnp.zeros_like(acc_ref)

        # Partial sum of the mean aggregation: counts(tn,tk) @ X(tk,fin),
        # bf16 operands, f32 accumulation on the MXU.
        acc_ref[...] += jnp.dot(a_ref[...], xk_ref[...],
                                preferred_element_type=jnp.float32)

        @pl.when(k == pl.num_programs(1) - 1)
        def _():
            # apply 1/deg (f32) after the f32-accumulated matmul
            agg = acc_ref[...] * invdeg_ref[...]            # (tn, fin)
            xr = xr_ref[...].astype(jnp.float32)            # (tn, fin)

            # merged x_row @ [Wr | Wp] (+ [bl | bp]) — one wide MXU matmul
            z = (jnp.dot(xr, wcat_ref[...],
                         preferred_element_type=jnp.float32) + bcat_ref[...])
            yl = jnp.dot(agg, wl_ref[...],
                         preferred_element_type=jnp.float32)

            if has_proj:
                y = yl + z[:, :fout]
                skip = z[:, fout:]
            else:
                y = yl + z
                skip = xr

            if mask_ref is not None:
                y = y * mask_ref[...]

            o_ref[...] = (skip + _gelu_tanh(y)).astype(o_ref.dtype)

    return kernel


# ----------------------------------------------------------------------------
# Wrapper
# ----------------------------------------------------------------------------
def gcn_resnet_forward(x, edge_index, params, *, dropout_p=0.2,
                       training=False, dropout_rng=None, dropout_mask=None,
                       node_tile=256, k_tile=512):
    """x: [N, in_features] f32, edge_index: [2, E] int32 (row0=src, row1=dst).

    params: dict with
      wl: (Fin, Fout)  SAGEConv neighbor weight (already transposed)
      bl: (Fout,)      SAGEConv bias
      wr: (Fin, Fout)  SAGEConv root weight
      wp: (Fin, Fout)  projection weight (omit / None when Fin == Fout)
      bp: (Fout,)      projection bias   (omit / None when Fin == Fout)
    """
    N, fin = x.shape
    wl, bl, wr = params["wl"], params["bl"], params["wr"]
    wp, bp = params.get("wp"), params.get("bp")
    fout = wl.shape[1]
    if fin < fout:
        raise ValueError("GCNResnet requires in_features >= out_features")
    has_proj = wp is not None
    if not has_proj and fin != fout:
        raise ValueError("identity skip (wp=None) requires in_features == out_features")

    # --- plain-JAX glue: dense 0/1 (count) adjacency + per-row inverse degree
    src, dst = edge_index[0], edge_index[1]
    adj = jnp.zeros((N, N), jnp.float32).at[dst, src].add(1.0)
    deg = jnp.sum(adj, axis=1, keepdims=True)
    inv_deg = 1.0 / jnp.maximum(deg, 1.0)                    # (N, 1) f32

    # --- merged right / projection weights (one wide x_row matmul in-kernel)
    if has_proj:
        wcat = jnp.concatenate([wr, wp], axis=1).astype(jnp.float32)
        bcat = jnp.concatenate([bl, bp]).reshape(1, 2 * fout).astype(jnp.float32)
    else:
        wcat = wr.astype(jnp.float32)
        bcat = bl.reshape(1, fout).astype(jnp.float32)
    wcols = wcat.shape[1]

    # --- dropout mask (inverted dropout, scale folded in); no mask input in eval
    use_mask = bool(training)
    if use_mask and dropout_mask is None:
        keep = jax.random.bernoulli(dropout_rng, 1.0 - dropout_p, (N, fout))
        dropout_mask = keep.astype(jnp.float32) / (1.0 - dropout_p)

    # --- tiling / zero-padding so all blocks divide evenly
    tn = min(node_tile, _round_up(N, 16))     # bf16 sublane-friendly row tile
    tk = min(k_tile, _round_up(N, 128))       # lane-aligned contraction tile
    np_r = _round_up(N, tn)
    np_k = _round_up(N, tk)

    adj_p = jnp.pad(adj, ((0, np_r - N), (0, np_k - N))).astype(jnp.bfloat16)
    xk_p = jnp.pad(x, ((0, np_k - N), (0, 0))).astype(jnp.bfloat16)
    xr_p = jnp.pad(x, ((0, np_r - N), (0, 0))).astype(jnp.float32)
    invdeg_p = jnp.pad(inv_deg, ((0, np_r - N), (0, 0)))

    grid = (np_r // tn, np_k // tk)

    resident = dict(pipeline_mode=pl.Buffered(1))   # constant index -> 1 buffer
    in_specs = [
        pl.BlockSpec((tn, tk), lambda i, k: (i, k)),            # A tile (bf16)
        pl.BlockSpec((tk, fin), lambda i, k: (k, 0)),           # X k-tile (bf16)
        pl.BlockSpec((tn, fin), lambda i, k: (i, 0)),           # X row-tile (f32)
        pl.BlockSpec((tn, 1), lambda i, k: (i, 0)),             # 1/deg row-tile
        pl.BlockSpec((fin, fout), lambda i, k: (0, 0), **resident),   # Wl
        pl.BlockSpec((fin, wcols), lambda i, k: (0, 0), **resident),  # [Wr|Wp]
        pl.BlockSpec((1, wcols), lambda i, k: (0, 0), **resident),    # [bl|bp]
    ]
    args = [adj_p, xk_p, xr_p, invdeg_p,
            wl.astype(jnp.float32), wcat, bcat]
    if use_mask:
        mask_p = jnp.pad(dropout_mask.astype(jnp.float32),
                         ((0, np_r - N), (0, 0)))
        in_specs.append(pl.BlockSpec((tn, fout), lambda i, k: (i, 0)))
        args.append(mask_p)

    # VMEM limit: ~48 MiB on v7x (64 MiB physical), ~96 MiB on v5e/v6e.
    try:
        vmem_cap = pltpu.get_tpu_info().vmem_capacity_bytes
    except Exception:
        vmem_cap = 64 * 1024 * 1024
    vmem_limit = int(min(vmem_cap * 3 // 4, 100 * 1024 * 1024))

    out = pl.pallas_call(
        _make_kernel(has_proj, use_mask, fout),
        out_shape=jax.ShapeDtypeStruct((np_r, fout), x.dtype),
        grid=grid,
        in_specs=in_specs,
        out_specs=pl.BlockSpec((tn, fout), lambda i, k: (i, 0)),
        scratch_shapes=[pltpu.VMEM((tn, fin), jnp.float32)],
        compiler_params=pltpu.CompilerParams(
            dimension_semantics=("parallel", "arbitrary"),
            vmem_limit_bytes=vmem_limit),
    )(*args)
    return out[:N]


# ----------------------------------------------------------------------------
# Plain-JAX reference (exact module semantics, same GELU approximation)
# ----------------------------------------------------------------------------
def _reference(x, edge_index, params, mask=None):
    N = x.shape[0]
    src, dst = edge_index[0], edge_index[1]
    hp = jax.lax.Precision.HIGHEST
    agg = jnp.zeros_like(x).at[dst].add(x[src])
    deg = jnp.zeros((N,), jnp.float32).at[dst].add(1.0)
    agg = agg / jnp.maximum(deg, 1.0)[:, None]
    y = (jnp.dot(agg, params["wl"], precision=hp) + params["bl"]
         + jnp.dot(x, params["wr"], precision=hp))
    if mask is not None:
        y = y * mask
    if params.get("wp") is not None:
        skip = jnp.dot(x, params["wp"], precision=hp) + params["bp"]
    else:
        skip = x
    return skip + _gelu_tanh(y)


# ----------------------------------------------------------------------------
# Demo / smoke test
# ----------------------------------------------------------------------------
if __name__ == "__main__":
    N, E = 64, 192
    dropout_p = 0.2

    root = jax.random.PRNGKey(0)
    (kx, ks, kd, kwl, kbl, kwr, kwp, kbp,
     kdrop, kx2, kwl2, kwr2) = jax.random.split(root, 12)

    # ---------- projection path: fin=256 -> fout=128 ----------
    fin, fout = 256, 128
    x = jax.random.normal(kx, (N, fin), dtype=jnp.float32)
    src = jax.random.randint(ks, (E,), 0, N, dtype=jnp.int32)
    dst = jax.random.randint(kd, (E,), 0, N, dtype=jnp.int32)
    edge_index = jnp.stack([src, dst])

    s_in = 1.0 / math.sqrt(fin)
    params = dict(
        wl=jax.random.normal(kwl, (fin, fout), jnp.float32) * s_in,
        bl=jax.random.normal(kbl, (fout,), jnp.float32) * 0.1,
        wr=jax.random.normal(kwr, (fin, fout), jnp.float32) * s_in,
        wp=jax.random.normal(kwp, (fin, fout), jnp.float32) * s_in,
        bp=jax.random.normal(kbp, (fout,), jnp.float32) * 0.1,
    )

    # eval mode (no dropout mask input at all)
    out_eval = jax.block_until_ready(
        gcn_resnet_forward(x, edge_index, params,
                           dropout_p=dropout_p, training=False))
    ref_eval = _reference(x, edge_index, params)
    assert out_eval.shape == (N, fout) and out_eval.dtype == x.dtype
    assert jnp.allclose(out_eval, ref_eval, atol=5e-2, rtol=5e-2), \
        "eval-mode mismatch vs reference"

    # training mode (deterministic precomputed dropout mask)
    keep = jax.random.bernoulli(kdrop, 1.0 - dropout_p, (N, fout))
    mask = keep.astype(jnp.float32) / (1.0 - dropout_p)
    out_train = jax.block_until_ready(
        gcn_resnet_forward(x, edge_index, params, dropout_p=dropout_p,
                           training=True, dropout_mask=mask))
    ref_train = _reference(x, edge_index, params, mask)
    assert jnp.allclose(out_train, ref_train, atol=5e-2, rtol=5e-2), \
        "training-mode mismatch vs reference"

    # ---------- identity-skip path: fin == fout == 128 ----------
    fin2 = fout2 = 128
    x2 = jax.random.normal(kx2, (N, fin2), dtype=jnp.float32)
    s2 = 1.0 / math.sqrt(fin2)
    params2 = dict(
        wl=jax.random.normal(kwl2, (fin2, fout2), jnp.float32) * s2,
        bl=jax.random.normal(kbl, (fout2,), jnp.float32) * 0.1,
        wr=jax.random.normal(kwr2, (fin2, fout2), jnp.float32) * s2,
    )
    out_id = jax.block_until_ready(
        gcn_resnet_forward(x2, edge_index, params2, training=False))
    ref_id = _reference(x2, edge_index, params2)
    assert jnp.allclose(out_id, ref_id, atol=5e-2, rtol=5e-2), \
        "identity-skip mismatch vs reference"

    print("KERNEL_OK")
</pallas_src>

<mosaic_0001>
module attributes {stable_mosaic.version = 11 : i64} {
  func.func @kernel(%arg0: i32, %arg1: i32, %arg2: memref<64x128xbf16, #tpu.memory_space<vmem>>, %arg3: memref<128x256xbf16, #tpu.memory_space<vmem>>, %arg4: memref<64x256xf32, #tpu.memory_space<vmem>>, %arg5: memref<64x1xf32, #tpu.memory_space<vmem>>, %arg6: memref<256x128xf32, #tpu.memory_space<vmem>>, %arg7: memref<256x256xf32, #tpu.memory_space<vmem>>, %arg8: memref<1x256xf32, #tpu.memory_space<vmem>>, %arg9: memref<64x128xf32, #tpu.memory_space<vmem>>, %arg10: memref<64x256xf32, #tpu.memory_space<vmem>>) attributes {dimension_semantics = [#tpu.dimension_semantics<parallel>, #tpu.dimension_semantics<arbitrary>], iteration_bounds = array<i64: 1, 1>, scalar_prefetch = 0 : i64, scratch_operands = 1 : i64, tpu.core_type = #tpu.core_type<tc>, window_params = [{transform_indices = @transform_0, window_bounds = array<i64: 64, 128>}, {transform_indices = @transform_1, window_bounds = array<i64: 128, 256>}, {transform_indices = @transform_2, window_bounds = array<i64: 64, 256>}, {transform_indices = @transform_3, window_bounds = array<i64: 64, 1>}, {pipeline_mode = #tpu.pipeline_mode<synchronous>, transform_indices = @transform_4, window_bounds = array<i64: 256, 128>}, {pipeline_mode = #tpu.pipeline_mode<synchronous>, transform_indices = @transform_5, window_bounds = array<i64: 256, 256>}, {pipeline_mode = #tpu.pipeline_mode<synchronous>, transform_indices = @transform_6, window_bounds = array<i64: 1, 256>}, {transform_indices = @transform_7, window_bounds = array<i64: 64, 128>}]} {
    %c0_i32 = arith.constant 0 : i32
    %0 = arith.cmpi eq, %arg1, %c0_i32 : i32
    %1 = arith.extui %0 : i1 to i32
    %c0_i32_0 = arith.constant 0 : i32
    %2 = arith.cmpi ne, %1, %c0_i32_0 : i32
    scf.if %2 {
      %cst_10 = arith.constant 0.000000e+00 : f32
      %12 = vector.broadcast %cst_10 : f32 to vector<64x256xf32>
      %c0_11 = arith.constant 0 : index
      %c0_12 = arith.constant 0 : index
      %13 = vector.load %arg10[%c0_11, %c0_12] : memref<64x256xf32, #tpu.memory_space<vmem>>, vector<64x256xf32>
      tpu.vector_store %arg10[%c0_11, %c0_12], %12 {strides = array<i32>} : memref<64x256xf32, #tpu.memory_space<vmem>>, vector<64x256xf32>,
    } else {
    }
    %c0 = arith.constant 0 : index
    %c0_1 = arith.constant 0 : index
    %3 = vector.load %arg10[%c0, %c0_1] : memref<64x256xf32, #tpu.memory_space<vmem>>, vector<64x256xf32>
    %c0_2 = arith.constant 0 : index
    %c0_3 = arith.constant 0 : index
    %4 = vector.load %arg2[%c0_2, %c0_3] : memref<64x128xbf16, #tpu.memory_space<vmem>>, vector<64x128xbf16>
    %c0_4 = arith.constant 0 : index
    %c0_5 = arith.constant 0 : index
    %5 = vector.load %arg3[%c0_4, %c0_5] : memref<128x256xbf16, #tpu.memory_space<vmem>>, vector<128x256xbf16>
    %cst = arith.constant dense<0.000000e+00> : vector<64x256xf32>
    %6 = tpu.matmul %4, %5, %cst {dimension_numbers = #tpu.dot_dimension_numbers<[1], [0], [0], [1], [0, 0, 1, 1], [], []>} : vector<64x128xbf16>, vector<128x256xbf16>, vector<64x256xf32> -> vector<64x256xf32>
    %7 = arith.addf %3, %6 : vector<64x256xf32>
    %c0_6 = arith.constant 0 : index
    %c0_7 = arith.constant 0 : index
    %8 = vector.load %arg10[%c0_6, %c0_7] : memref<64x256xf32, #tpu.memory_space<vmem>>, vector<64x256xf32>
    tpu.vector_store %arg10[%c0_6, %c0_7], %7 {strides = array<i32>} : memref<64x256xf32, #tpu.memory_space<vmem>>, vector<64x256xf32>,
    %c0_i32_8 = arith.constant 0 : i32
    %9 = arith.cmpi eq, %arg1, %c0_i32_8 : i32
    %10 = arith.extui %9 : i1 to i32
    %c0_i32_9 = arith.constant 0 : i32
    %11 = arith.cmpi ne, %10, %c0_i32_9 : i32
    scf.if %11 {
      %c0_10 = arith.constant 0 : index
      %c0_11 = arith.constant 0 : index
      %12 = vector.load %arg10[%c0_10, %c0_11] : memref<64x256xf32, #tpu.memory_space<vmem>>, vector<64x256xf32>
      %c0_12 = arith.constant 0 : index
      %c0_13 = arith.constant 0 : index
      %13 = vector.load %arg5[%c0_12, %c0_13] : memref<64x1xf32, #tpu.memory_space<vmem>>, vector<64x1xf32>
      %14 = vector.broadcast %13 : vector<64x1xf32> to vector<64x256xf32>
      %15 = arith.mulf %12, %14 : vector<64x256xf32>
      %c0_14 = arith.constant 0 : index
      %c0_15 = arith.constant 0 : index
      %16 = vector.load %arg4[%c0_14, %c0_15] : memref<64x256xf32, #tpu.memory_space<vmem>>, vector<64x256xf32>
      %c0_16 = arith.constant 0 : index
      %c0_17 = arith.constant 0 : index
      %17 = vector.load %arg7[%c0_16, %c0_17] : memref<256x256xf32, #tpu.memory_space<vmem>>, vector<256x256xf32>
      %cst_18 = arith.constant dense<0.000000e+00> : vector<64x256xf32>
      %18 = tpu.matmul %16, %17, %cst_18 {dimension_numbers = #tpu.dot_dimension_numbers<[1], [0], [0], [1], [0, 0, 1, 1], [], []>} : vector<64x256xf32>, vector<256x256xf32>, vector<64x256xf32> -> vector<64x256xf32>
      %c0_19 = arith.constant 0 : index
      %c0_20 = arith.constant 0 : index
      %19 = vector.load %arg8[%c0_19, %c0_20] : memref<1x256xf32, #tpu.memory_space<vmem>>, vector<1x256xf32>
      %20 = vector.broadcast %19 : vector<1x256xf32> to vector<64x256xf32>
      %21 = arith.addf %18, %20 : vector<64x256xf32>
      %c0_21 = arith.constant 0 : index
      %c0_22 = arith.constant 0 : index
      %22 = vector.load %arg6[%c0_21, %c0_22] : memref<256x128xf32, #tpu.memory_space<vmem>>, vector<256x128xf32>
      %cst_23 = arith.constant dense<0.000000e+00> : vector<64x128xf32>
      %23 = tpu.matmul %15, %22, %cst_23 {dimension_numbers = #tpu.dot_dimension_numbers<[1], [0], [0], [1], [0, 0, 1, 1], [], []>} : vector<64x256xf32>, vector<256x128xf32>, vector<64x128xf32> -> vector<64x128xf32>
      %24 = vector.extract_strided_slice %21 {offsets = [0, 0], sizes = [64, 128], strides = [1, 1]} : vector<64x256xf32> to vector<64x128xf32>
      %25 = arith.addf %23, %24 : vector<64x128xf32>
      %26 = vector.extract_strided_slice %21 {offsets = [0, 128], sizes = [64, 128], strides = [1, 1]} : vector<64x256xf32> to vector<64x128xf32>
      %cst_24 = arith.constant 5.000000e-01 : f32
      %27 = vector.broadcast %cst_24 : f32 to vector<64x128xf32>
      %28 = arith.mulf %27, %25 : vector<64x128xf32>
      %cst_25 = arith.constant 4.471500e-02 : f32
      %29 = vector.broadcast %cst_25 : f32 to vector<64x128xf32>
      %30 = arith.mulf %29, %25 : vector<64x128xf32>
      %31 = arith.mulf %30, %25 : vector<64x128xf32>
      %32 = arith.mulf %31, %25 : vector<64x128xf32>
      %33 = arith.addf %25, %32 : vector<64x128xf32>
      %cst_26 = arith.constant 0.797884583 : f32
      %34 = vector.broadcast %cst_26 : f32 to vector<64x128xf32>
      %35 = arith.mulf %34, %33 : vector<64x128xf32>
      %36 = math.tanh %35 : vector<64x128xf32>
      %cst_27 = arith.constant 1.000000e+00 : f32
      %37 = vector.broadcast %cst_27 : f32 to vector<64x128xf32>
      %38 = arith.addf %37, %36 : vector<64x128xf32>
      %39 = arith.mulf %28, %38 : vector<64x128xf32>
      %40 = arith.addf %26, %39 : vector<64x128xf32>
      %c0_28 = arith.constant 0 : index
      %c0_29 = arith.constant 0 : index
      %41 = vector.load %arg9[%c0_28, %c0_29] : memref<64x128xf32, #tpu.memory_space<vmem>>, vector<64x128xf32>
      tpu.vector_store %arg9[%c0_28, %c0_29], %40 {strides = array<i32>} : memref<64x128xf32, #tpu.memory_space<vmem>>, vector<64x128xf32>,
    } else {
    }
    return
  }
  func.func @transform_0(%arg0: i32, %arg1: i32) -> (i32, i32) {
    %c0_i32 = arith.constant 0 : i32
    return %arg0, %arg1 : i32, i32
  }
  func.func @transform_1(%arg0: i32, %arg1: i32) -> (i32, i32) {
    %c0_i32 = arith.constant 0 : i32
    %c0_i32_0 = arith.constant 0 : i32
    return %arg1, %c0_i32 : i32, i32
  }
  func.func @transform_2(%arg0: i32, %arg1: i32) -> (i32, i32) {
    %c0_i32 = arith.constant 0 : i32
    %c0_i32_0 = arith.constant 0 : i32
    return %arg0, %c0_i32 : i32, i32
  }
  func.func @transform_3(%arg0: i32, %arg1: i32) -> (i32, i32) {
    %c0_i32 = arith.constant 0 : i32
    %c0_i32_0 = arith.constant 0 : i32
    return %arg0, %c0_i32 : i32, i32
  }
  func.func @transform_4(%arg0: i32, %arg1: i32) -> (i32, i32) {
    %c0_i32 = arith.constant 0 : i32
    %c0_i32_0 = arith.constant 0 : i32
    %c0_i32_1 = arith.constant 0 : i32
    return %c0_i32, %c0_i32_0 : i32, i32
  }
  func.func @transform_5(%arg0: i32, %arg1: i32) -> (i32, i32) {
    %c0_i32 = arith.constant 0 : i32
    %c0_i32_0 = arith.constant 0 : i32
    %c0_i32_1 = arith.constant 0 : i32
    return %c0_i32, %c0_i32_0 : i32, i32
  }
  func.func @transform_6(%arg0: i32, %arg1: i32) -> (i32, i32) {
    %c0_i32 = arith.constant 0 : i32
    %c0_i32_0 = arith.constant 0 : i32
    %c0_i32_1 = arith.constant 0 : i32
    return %c0_i32, %c0_i32_0 : i32, i32
  }
  func.func @transform_7(%arg0: i32, %arg1: i32) -> (i32, i32) {
    %c0_i32 = arith.constant 0 : i32
    %c0_i32_0 = arith.constant 0 : i32
    return %arg0, %c0_i32 : i32, i32
  }
}

</mosaic_0001>

<bundles_post_ra>
// kernel: tpu_custom_call.1
= control target key start
LH: loop header
LB: loop body
LE: loop exit
PB: predicated region body
PF: predicated region fallthrough
CT: control target
= control target key end

     0   :  { %12 = vsyncpa [#allocation4], 0  ;;  %s1347_s0 = inlined_call_operand.vmem [shape: bf16[64,128], index: 0, kind: input, shape index: {}]   ;;  %s1348_s1 = inlined_call_operand.hbm [shape: bf16[128,256], index: 1, kind: input, shape index: {}]   ;;  %s1349_s2 = inlined_call_operand.hbm [shape: f32[64,256], index: 2, kind: input, shape index: {}]   ;;  %s1350_s3 = inlined_call_operand.vmem [shape: f32[64,1], index: 3, kind: input, shape index: {}]   ;;  %s1351_s4 = inlined_call_operand.hbm [shape: f32[256,128], index: 4, kind: input, shape index: {}]   ;;  %s1352_s5 = inlined_call_operand.hbm [shape: f32[256,256], index: 5, kind: input, shape index: {}]   ;;  %s1353_s6 = inlined_call_operand.vmem [shape: f32[1,256], index: 6, kind: input, shape index: {}]   ;;  %s1354_s7 = inlined_call_operand.hbm [shape: f32[64,128], index: 7, kind: output, shape index: {}]  }
   0x1   :  { %13 = vsyncpa [#allocation7], 0 }
   0x2   :  { %14 = vsyncpa [#allocation10], 0 }
   0x3   :  { %15 = vsyncpa [#allocation5], 0  ;;  %s1124_s24 = smov [#allocation6]  }
   0x4   :  { %s35_s25 = sshll.u32 %s1124_s24, 4  ;;  %s36_s25 = int_to_ptr.vmem [resolvable:$true] %s35_s25 }
   0x5   :  { %s1024_s26 = scalar_lea.vmem %s36_s25, 2048  ;;  %p1029_p1 = scmp.lt.s32.totalorder %s36_s25, %s36_s25 }
   0x6   :  { %p1025_p0 = scmp.ne.s32.totalorder %s36_s25, %s1024_s26  ;;  %p1030_p2 = scmp.lt.s32.totalorder %s1024_s26, %s1024_s26 }
   0x8   :  { %p1031_p3 = por %p1030_p2, %p1029_p1 }
   0xa   :  { %p1032_p4 = pnand %p1031_p3, %p1025_p0 }
   0xc   :  { %1035 = shalt.err (!%p1032_p4)
}
   0xd   :  { %s1125_s27 = smov 256   ;;  %s1126_s28 = smov 16  }
   0xe   :  { %41 = dma.hbm_to_vmem [thread:$0]  %s1349_s2, 2048, %s36_s25, [#allocation7], %s1125_s27, %s1125_s27, %s1126_s28  }
   0xf   :  { %s1127_s8 = smov [#allocation3]  }
  0x10   :  { %s23_s9 = sshll.u32 %s1127_s8, 4  ;;  %s24_s9 = int_to_ptr.vmem [resolvable:$true] %s23_s9 }
  0x11   :  { %s1044_s10 = scalar_lea.vmem %s24_s9, 2048  ;;  %p1049_p6 = scmp.lt.s32.totalorder %s24_s9, %s24_s9 }
  0x12   :  { %p1045_p5 = scmp.ne.s32.totalorder %s24_s9, %s1044_s10  ;;  %p1050_p7 = scmp.lt.s32.totalorder %s1044_s10, %s1044_s10 }
  0x14   :  { %p1051_p8 = por %p1050_p7, %p1049_p6 }
  0x16   :  { %p1052_p9 = pnand %p1051_p8, %p1045_p5 }
  0x18   :  { %1055 = shalt.err (!%p1052_p9)
}
  0x19   :  { %s1128_s11 = smov 128   ;;  %s1129_s12 = smov 8  }
  0x1a   :  { %29 = dma.hbm_to_vmem [thread:$0]  %s1348_s1, 2048, %s24_s9, [#allocation4], %s1128_s11, %s1128_s11, %s1129_s12  }
  0x1b   :  { %s1130_s2 = smov [#allocation8]   ;;  %s1131_s16 = smov [#allocation9]  }
  0x1c   :  { %s49_s15 = sshll.u32 %s1130_s2, 4  ;;  %s61_s17 = sshll.u32 %s1131_s16, 4  ;;  %s50_s15 = int_to_ptr.vmem [resolvable:$true] %s49_s15  ;;  %s62_s17 = int_to_ptr.vmem [resolvable:$true] %s61_s17 }
  0x1d   :  { %s1064_s18 = scalar_lea.vmem %s50_s15, 4096  ;;  %p1069_p11 = scmp.lt.s32.totalorder %s50_s15, %s50_s15 }
  0x1e   :  { %p1065_p10 = scmp.ne.s32.totalorder %s50_s15, %s1064_s18  ;;  %p1070_p12 = scmp.lt.s32.totalorder %s1064_s18, %s1064_s18 }
  0x20   :  { %p1071_p13 = por %p1070_p12, %p1069_p11 }
  0x22   :  { %p1072_p0 = pnand %p1071_p13, %p1065_p10 }
  0x24   :  { %1075 = shalt.err (!%p1072_p0)
}
  0x25   :  { %55 = dma.hbm_to_vmem [thread:$0]  %s1351_s4, 4096, %s50_s15, [#allocation7], %s1128_s11, %s1128_s11, %s1129_s12  }
  0x26   :  { %s1084_s1 = scalar_lea.vmem %s62_s17, 8192  ;;  %p1089_p2 = scmp.lt.s32.totalorder %s62_s17, %s62_s17 }
  0x27   :  { %p1085_p1 = scmp.ne.s32.totalorder %s62_s17, %s1084_s1  ;;  %p1090_p3 = scmp.lt.s32.totalorder %s1084_s1, %s1084_s1 }
  0x29   :  { %p1091_p4 = por %p1090_p3, %p1089_p2 }
  0x2b   :  { %p1092_p5 = pnand %p1091_p4, %p1085_p1 }
  0x2d   :  { %1095 = shalt.err (!%p1092_p5)
}
  0x2e   :  { %67 = dma.hbm_to_vmem [thread:$0]  %s1352_s5, 8192, %s62_s17, [#allocation10], %s1125_s27, %s1125_s27, %s1126_s28  }
  0x2f   :  { %1116 = dma.done.wait [#allocation4], 2048  }
  0x30   :  { %1117 = vsyncadd [#allocation4], 4294965248 }
  0x31   :  { %1118 = dma.done.wait [#allocation7], 6144  }
  0x32   :  { %1119 = vsyncadd [#allocation7], 4294961152 }
  0x33   :  { %1120 = dma.done.wait [#allocation10], 8192  }
  0x34   :  { %1121 = vsyncadd [#allocation10], 4294959104  ;;  %v1132_v0 = vmov 0   ;;  %v972_v1 = vld [vmem:[#allocation3 + $0x74] ss:$8 sps:$4 sm:$0xff]   ;;  %v371_v10 = vld [vmem:[%s1350_s3] sm:$0xff] }
  0x35   :  { %279 = vmatprep.mubr.bf16.mxu0 %v1132_v0  ;;  %970 = vset.pattern.permute.xlu0 %v1132_v0  ;;  %v974_v2 = vld [vmem:[#allocation3 + $0x70] ss:$8 sps:$4 sm:$0xff]   ;;  %v975_v3 = vld [vmem:[#allocation3 + $0x64] ss:$8 sps:$4 sm:$0xff]   ;;  %v977_v4 = vld [vmem:[#allocation3 + $0x60] ss:$8 sps:$4 sm:$0xff]  }
  0x36   :  { %971 = vset.pattern.permute.xlu1 %v1132_v0  ;;  %247 = vmatprep.subr.bf16.mxu0 %v972_v1  ;;  %v978_v5 = vld [vmem:[#allocation3 + $0x54] ss:$8 sps:$4 sm:$0xff]   ;;  %v980_v6 = vld [vmem:[#allocation3 + $0x50] ss:$8 sps:$4 sm:$0xff]   ;;  %v981_v7 = vld [vmem:[#allocation3 + $0x44] ss:$8 sps:$4 sm:$0xff]  }
  0x37   :  { %248 = vmatpush1.bf16.msra.mxu0 %v974_v2  ;;  %v983_v8 = vld [vmem:[#allocation3 + $0x40] ss:$8 sps:$4 sm:$0xff]   ;;  %v984_v9 = vld [vmem:[#allocation3 + $0x34] ss:$8 sps:$4 sm:$0xff]   ;;  %v986_v11 = vld [vmem:[#allocation3 + $0x30] ss:$8 sps:$4 sm:$0xff]   ;;  %381 = vperm.xlu0 %970, %v371_v10  }
  0x38   :  { %249 = vmatprep.subr.bf16.mxu0 %v975_v3  ;;  %v373_v12 = vld [vmem:[%s1350_s3 + $0x10] sm:$0xff]  ;;  %v987_v13 = vld [vmem:[#allocation3 + $0x24] ss:$8 sps:$4 sm:$0xff]   ;;  %v374_v15 = vld [vmem:[%s1350_s3 + $0x18] sm:$0xff] }
  0x39   :  { %v372_v14 = vld [vmem:[%s1350_s3 + $0x8] sm:$0xff]  ;;  %391 = vperm.xlu1 %971, %v373_v12   ;;  %v482_v16 = vld [vmem:[#allocation9 + $0xf8] sm:$0xff]  ;;  %v481_v17 = vld [vmem:[#allocation9 + $0xf0] sm:$0xff] }
  0x3a   :  { %527 = vmatprep.subr.mxu1 %v482_v16  ;;  %v989_v18 = vld [vmem:[#allocation3 + $0x20] ss:$8 sps:$4 sm:$0xff]   ;;  %v990_v20 = vld [vmem:[#allocation3 + $0x14] ss:$8 sps:$4 sm:$0xff]   ;;  %v992_v24 = vld [vmem:[#allocation3 + $0x10] ss:$8 sps:$4 sm:$0xff]  }
  0x3b   :  { %250 = vmatpush1.bf16.msra.mxu0 %v977_v4  ;;  %386 = vperm.xlu0 %970, %v372_v14   ;;  %v480_v19 = vld [vmem:[#allocation9 + $0xe8] sm:$0xff]  ;;  %v375_v21 = vld [vmem:[%s1350_s3 + $0x20] sm:$0xff]  ;;  %v478_v25 = vld [vmem:[#allocation9 + $0xd8] sm:$0xff] }
  0x3c   :  { %251 = vmatprep.subr.bf16.mxu0 %v978_v5  ;;  %v376_v22 = vld [vmem:[%s1350_s3 + $0x28] sm:$0xff]  ;;  %528 = vmatpush1.msra.mxu1 %v481_v17  ;;  %v479_v23 = vld [vmem:[#allocation9 + $0xe0] sm:$0xff]  ;;  %v377_v27 = vld [vmem:[%s1350_s3 + $0x30] sm:$0xff] }
  0x3d   :  { %396 = vperm.xlu1 %971, %v374_v15   ;;  %529 = vmatprep.subr.mxu1 %v480_v19  ;;  %v993_v26 = vld [vmem:[#allocation3 + $0x4] ss:$8 sps:$4 sm:$0xff]   ;;  %v378_v28 = vld [vmem:[%s1350_s3 + $0x38] sm:$0xff]  ;;  %v477_v29 = vld [vmem:[#allocation9 + $0xd0] sm:$0xff] }
  0x3e   :  { %530 = vmatpush1.msra.mxu1 %v479_v23  ;;  %v995_v30 = vld [vmem:[#allocation3] ss:$8 sps:$4 sm:$0xff]   ;;  %v474_v33 = vld [vmem:[#allocation9 + $0xb8] sm:$0xff]  ;;  %v473_v36 = vld [vmem:[#allocation9 + $0xb0] sm:$0xff] }
  0x3f   :  { %252 = vmatpush1.bf16.msra.mxu0 %v980_v6  ;;  %401 = vperm.xlu0 %970, %v375_v21   ;;  %v476_v31 = vld [vmem:[#allocation9 + $0xc8] sm:$0xff]  ;;  %v475_v32 = vld [vmem:[#allocation9 + $0xc0] sm:$0xff]  ;;  %v671_v34 = vld [vmem:[#allocation8 + $0xf8] sm:$0xff] }
  0x40   :  { %253 = vmatprep.subr.bf16.mxu0 %v981_v7  ;;  %531 = vmatprep.subr.mxu1 %v478_v25  ;;  %v996_v35 = vld [vmem:[%s1347_s0] sm:$0xff]   ;;  %v472_v37 = vld [vmem:[#allocation9 + $0xa8] sm:$0xff]  ;;  %v470_v39 = vld [vmem:[#allocation9 + $0x98] sm:$0xff] }
  0x41   :  { %406 = vperm.xlu1 %971, %v376_v22   ;;  %532 = vmatpush1.msra.mxu1 %v477_v29  ;;  %v471_v38 = vld [vmem:[#allocation9 + $0xa0] sm:$0xff]  ;;  %v655_v40 = vld [vmem:[#allocation8 + $0x78] sm:$0xff]  ;;  %v469_v41 = vld [vmem:[#allocation9 + $0x90] sm:$0xff] }
  0x42   :  { %533 = vmatprep.subr.mxu1 %v476_v31  ;;  %v670_v42 = vld [vmem:[#allocation8 + $0xf0] sm:$0xff]  ;;  %v468_v43 = vld [vmem:[#allocation9 + $0x88] sm:$0xff]  ;;  %v467_v45 = vld [vmem:[#allocation9 + $0x80] sm:$0xff] }
  0x43   :  { %254 = vmatpush1.bf16.msra.mxu0 %v983_v8  ;;  %411 = vperm.xlu0 %970, %v377_v27   ;;  %v654_v44 = vld [vmem:[#allocation8 + $0x70] sm:$0xff]  ;;  %v669_v46 = vld [vmem:[#allocation8 + $0xe8] sm:$0xff]  ;;  %v466_v47 = vld [vmem:[#allocation9 + $0x78] sm:$0xff] }
  0x44   :  { %255 = vmatprep.subr.bf16.mxu0 %v984_v9  ;;  %534 = vmatpush1.msra.mxu1 %v475_v32  ;;  %v653_v48 = vld [vmem:[#allocation8 + $0x68] sm:$0xff]  ;;  %v465_v50 = vld [vmem:[#allocation9 + $0x70] sm:$0xff]  ;;  %v668_v51 = vld [vmem:[#allocation8 + $0xe0] sm:$0xff] }
  0x45   :  { %416 = vperm.xlu1 %971, %v378_v28   ;;  %535 = vmatprep.subr.mxu1 %v474_v33  ;;  %v997_v49 = vld [vmem:[%s1347_s0 + $0x8] sm:$0xff]   ;;  %v463_v53 = vld [vmem:[#allocation9 + $0x60] sm:$0xff]  ;;  %v462_v54 = vld [vmem:[#allocation9 + $0x58] sm:$0xff] }
  0x46   :  { %536 = vmatpush1.msra.mxu1 %v473_v36  ;;  %v464_v52 = vld [vmem:[#allocation9 + $0x68] sm:$0xff]  ;;  %v652_v55 = vld [vmem:[#allocation8 + $0x60] sm:$0xff]  ;;  %v461_v56 = vld [vmem:[#allocation9 + $0x50] sm:$0xff] }
  0x47   :  { %256 = vmatpush1.bf16.msra.mxu0 %v986_v11  ;;  %537 = vmatprep.subr.mxu1 %v472_v37  ;;  %v667_v57 = vld [vmem:[#allocation8 + $0xd8] sm:$0xff]  ;;  %v460_v58 = vld [vmem:[#allocation9 + $0x48] sm:$0xff]  ;;  %v459_v60 = vld [vmem:[#allocation9 + $0x40] sm:$0xff] }
  0x48   :  { %257 = vmatprep.subr.bf16.mxu0 %v987_v13  ;;  %538 = vmatpush1.msra.mxu1 %v471_v38  ;;  %v651_v59 = vld [vmem:[#allocation8 + $0x58] sm:$0xff]  ;;  %v666_v61 = vld [vmem:[#allocation8 + $0xd0] sm:$0xff]  ;;  %v665_v3 = vld [vmem:[#allocation8 + $0xc8] sm:$0xff] }
  0x49   :  { %539 = vmatprep.subr.mxu1 %v470_v39  ;;  %v458_v62 = vld [vmem:[#allocation9 + $0x38] sm:$0xff]  ;;  %v650_v63 = vld [vmem:[#allocation8 + $0x50] sm:$0xff]  ;;  %v456_v4 = vld [vmem:[#allocation9 + $0x28] sm:$0xff] }
  0x4a   :  { %540 = vmatpush1.msra.mxu1 %v469_v41  ;;  %v998_v1 = vld [vmem:[%s1347_s0 + $0x10] sm:$0xff]   ;;  %v455_v5 = vld [vmem:[#allocation9 + $0x20] sm:$0xff]  ;;  %v454_v6 = vld [vmem:[#allocation9 + $0x18] sm:$0xff] }
  0x4b   :  { %258 = vmatpush1.bf16.msra.mxu0 %v989_v18  ;;  %541 = vmatprep.subr.mxu1 %v468_v43  ;;  %v457_v2 = vld [vmem:[#allocation9 + $0x30] sm:$0xff]  ;;  %v649_v7 = vld [vmem:[#allocation8 + $0x48] sm:$0xff]  ;;  %v664_v9 = vld [vmem:[#allocation8 + $0xc0] sm:$0xff] }
  0x4c   :  { %259 = vmatprep.subr.bf16.mxu0 %v990_v20  ;;  %542 = vmatpush1.msra.mxu1 %v467_v45  ;;  %v453_v8 = vld [vmem:[#allocation9 + $0x10] sm:$0xff]  ;;  %v452_v10 = vld [vmem:[#allocation9 + $0x8] sm:$0xff]  ;;  %v648_v11 = vld [vmem:[#allocation8 + $0x40] sm:$0xff] }
  0x4d   :  { %543 = vmatprep.subr.mxu1 %v466_v47  ;;  %v451_v12 = vld [vmem:[#allocation9] sm:$0xff]  ;;  %v663_v13 = vld [vmem:[#allocation8 + $0xb8] sm:$0xff]  ;;  %v513_v17 = vld [vmem:[#allocation9 + $0x1f0] sm:$0xff] }
  0x4e   :  { %544 = vmatpush1.msra.mxu1 %v465_v50  ;;  %v514_v14 = vld [vmem:[#allocation9 + $0x1f8] sm:$0xff]  ;;  %v662_v18 = vld [vmem:[#allocation8 + $0xb0] sm:$0xff]  ;;  %v511_v19 = vld [vmem:[#allocation9 + $0x1e0] sm:$0xff] }
  0x4f   :  { %260 = vmatpush1.bf16.msra.mxu0 %v992_v24  ;;  %545 = vmatprep.subr.mxu1 %v464_v52  ;;  %v647_v15 = vld [vmem:[#allocation8 + $0x38] sm:$0xff]  ;;  %v646_v20 = vld [vmem:[#allocation8 + $0x30] sm:$0xff]  ;;  %v661_v22 = vld [vmem:[#allocation8 + $0xa8] sm:$0xff] }
  0x50   :  { %261 = vmatprep.subr.bf16.mxu0 %v993_v26  ;;  %546 = vmatpush1.msra.mxu1 %v463_v53  ;;  %v999_v16 = vld [vmem:[%s1347_s0 + $0x18] sm:$0xff]   ;;  %v509_v23 = vld [vmem:[#allocation9 + $0x1d0] sm:$0xff]  ;;  %v645_v24 = vld [vmem:[#allocation8 + $0x28] sm:$0xff] }
  0x51   :  { %547 = vmatprep.subr.mxu1 %v462_v54  ;;  %v510_v21 = vld [vmem:[#allocation9 + $0x1d8] sm:$0xff]  ;;  %v508_v25 = vld [vmem:[#allocation9 + $0x1c8] sm:$0xff]  ;;  %v660_v26 = vld [vmem:[#allocation8 + $0xa0] sm:$0xff] }
  0x52   :  { %548 = vmatpush1.msra.mxu1 %v461_v56  ;;  %v507_v27 = vld [vmem:[#allocation9 + $0x1c0] sm:$0xff]  ;;  %v506_v29 = vld [vmem:[#allocation9 + $0x1b8] sm:$0xff]  ;;  %v505_v31 = vld [vmem:[#allocation9 + $0x1b0] sm:$0xff] }
  0x53   :  { %262 = vmatpush1.bf16.msra.mxu0 %v995_v30  ;;  %549 = vmatprep.subr.mxu1 %v460_v58  ;;  %v644_v28 = vld [vmem:[#allocation8 + $0x20] sm:$0xff]  ;;  %v659_v30 = vld [vmem:[#allocation8 + $0x98] sm:$0xff]  ;;  %v504_v33 = vld [vmem:[#allocation9 + $0x1a8] sm:$0xff] }
  0x54   :  { %904 = vmatprep.subr.mxu0 %v671_v34  ;;  %550 = vmatpush1.msra.mxu1 %v459_v60  ;;  %v643_v32 = vld [vmem:[#allocation8 + $0x18] sm:$0xff]  ;;  %v658_v34 = vld [vmem:[#allocation8 + $0x90] sm:$0xff]  ;;  %v500_v38 = vld [vmem:[#allocation9 + $0x188] sm:$0xff] }
  0x55   :  { %551 = vmatprep.subr.mxu1 %v458_v62  ;;  %v502_v36 = vld [vmem:[#allocation9 + $0x198] sm:$0xff]  ;;  %v501_v37 = vld [vmem:[#allocation9 + $0x190] sm:$0xff]  ;;  %v499_v39 = vld [vmem:[#allocation9 + $0x180] sm:$0xff] }
  0x56   :  { %280 = vmatmul.mubr.bf16.vlgmr.msra.gmra.mxu0 %v996_v35  ;;  %552 = vmatpush1.msra.mxu1 %v457_v2  ;;  %v503_v35 = vld [vmem:[#allocation9 + $0x1a0] sm:$0xff]  ;;  %v497_v41 = vld [vmem:[#allocation9 + $0x170] sm:$0xff]  ;;  %v488_v50 = vld [vmem:[#allocation9 + $0x128] sm:$0xff] }
  0x57   :  { %289 = vmatprep.mubr.bf16.mxu0 %v1132_v0  ;;  %905 = vmatpush3.msra.mxu0 %v655_v40  ;;  %v498_v40 = vld [vmem:[#allocation9 + $0x178] sm:$0xff]  ;;  %v495_v43 = vld [vmem:[#allocation9 + $0x160] sm:$0xff]  ;;  %v493_v45 = vld [vmem:[#allocation9 + $0x150] sm:$0xff] }
  0x58   :  { %906 = vmatprep.subr.mxu0 %v670_v42  ;;  %553 = vmatprep.subr.mxu1 %v456_v4  ;;  %v496_v42 = vld [vmem:[#allocation9 + $0x168] sm:$0xff]  ;;  %v491_v47 = vld [vmem:[#allocation9 + $0x140] sm:$0xff]  ;;  %v486_v54 = vld [vmem:[#allocation9 + $0x118] sm:$0xff] }
  0x59   :  { %907 = vmatpush3.msra.mxu0 %v654_v44  ;;  %554 = vmatpush1.msra.mxu1 %v455_v5  ;;  %v494_v44 = vld [vmem:[#allocation9 + $0x158] sm:$0xff]  ;;  %v487_v52 = vld [vmem:[#allocation9 + $0x120] sm:$0xff]  ;;  %v657_v53 = vld [vmem:[#allocation8 + $0x88] sm:$0xff] }
  0x5a   :  { %908 = vmatprep.subr.mxu0 %v669_v46  ;;  %555 = vmatprep.subr.mxu1 %v454_v6  ;;  %v492_v46 = vld [vmem:[#allocation9 + $0x148] sm:$0xff]  ;;  %v485_v56 = vld [vmem:[#allocation9 + $0x110] sm:$0xff]  ;;  %v483_v60 = vld [vmem:[#allocation9 + $0x100] sm:$0xff] }
  0x5b   :  { %909 = vmatpush3.msra.mxu0 %v653_v48  ;;  %556 = vmatpush1.msra.mxu1 %v453_v8  ;;  %v490_v48 = vld [vmem:[#allocation9 + $0x138] sm:$0xff]  ;;  %v484_v58 = vld [vmem:[#allocation9 + $0x108] sm:$0xff]  ;;  %v435_v62 = vld [vmem:[#allocation6] sm:$0xff] }
  0x5c   :  { %910 = vmatprep.subr.mxu0 %v668_v51  ;;  %557 = vmatprep.subr.mxu1 %v452_v10  ;;  %v642_v51 = vld [vmem:[#allocation8 + $0x10] sm:$0xff]  ;;  %v440_v2 = vld [vmem:[#allocation6 + $0x28] sm:$0xff]  ;;  %v442_v4 = vld [vmem:[#allocation6 + $0x38] sm:$0xff] }
  0x5d   :  { %911 = vmatpush3.msra.mxu0 %v652_v55  ;;  %558 = vmatpush1.msra.mxu1 %v451_v12  ;;  %v641_v55 = vld [vmem:[#allocation8 + $0x8] sm:$0xff]  ;;  %v441_v5 = vld [vmem:[#allocation6 + $0x30] sm:$0xff]  ;;  %v446_v8 = vld [vmem:[#allocation6 + $0x58] sm:$0xff] }
  0x5e   :  { %290 = vmatmul.mubr.bf16.gmra.mxu0 %v997_v49  ;;  %912 = vmatprep.subr.mxu0 %v667_v57  ;;  %v489_v49 = vld [vmem:[#allocation9 + $0x130] sm:$0xff]  ;;  %v656_v57 = vld [vmem:[#allocation8 + $0x80] sm:$0xff]  ;;  %v444_v6 = vld [vmem:[#allocation6 + $0x48] sm:$0xff] }
  0x5f   :  { %299 = vmatprep.mubr.bf16.mxu0 %v1132_v0  ;;  %913 = vmatpush3.msra.mxu0 %v651_v59  ;;  %v640_v59 = vld [vmem:[#allocation8] sm:$0xff]  ;;  %v448_v10 = vld [vmem:[#allocation6 + $0x68] sm:$0xff]  ;;  %v450_v12 = vld [vmem:[#allocation6 + $0x78] sm:$0xff] }
  0x60   :  { %914 = vmatprep.subr.mxu0 %v666_v61  ;;  %559 = vmatprep.subr.mxu1 %v514_v14  ;;  %v436_v61 = vld [vmem:[#allocation6 + $0x8] sm:$0xff] }
  0x61   :  { %915 = vmatpush3.msra.mxu0 %v650_v63  ;;  %560 = vmatpush2.msra.mxu1 %v513_v17  ;;  %v438_v63 = vld [vmem:[#allocation6 + $0x18] sm:$0xff] }
  0x62   :  { %916 = vmatprep.subr.mxu0 %v665_v3  ;;  %591 = vmatprep.mubr.f32.mxu1 %v436_v61  ;;  %v439_v3 = vld [vmem:[#allocation6 + $0x20] sm:$0xff] }
  0x63   :  { %917 = vmatpush3.msra.mxu0 %v649_v7  ;;  %v443_v7 = vld [vmem:[#allocation6 + $0x40] sm:$0xff] }
  0x64   :  { %918 = vmatprep.subr.mxu0 %v664_v9  ;;  %v445_v9 = vld [vmem:[#allocation6 + $0x50] sm:$0xff] }
  0x65   :  { %919 = vmatpush3.msra.mxu0 %v648_v11  ;;  %v447_v11 = vld [vmem:[#allocation6 + $0x60] sm:$0xff] }
  0x66   :  { %300 = vmatmul.mubr.bf16.gmra.mxu0 %v998_v1  ;;  %920 = vmatprep.subr.mxu0 %v663_v13  ;;  %v437_v1 = vld [vmem:[#allocation6 + $0x10] sm:$0xff] }
  0x67   :  { %309 = vmatprep.mubr.bf16.mxu0 %v1132_v0  ;;  %v512_v0 = vld [vmem:[#allocation9 + $0x1e8] sm:$0xff]  ;;  %921 = vmatpush3.msra.mxu0 %v647_v15  ;;  %v449_v13 = vld [vmem:[#allocation6 + $0x70] sm:$0xff] }
  0x68   :  { %922 = vmatprep.subr.mxu0 %v662_v18  ;;  %561 = vmatprep.subr.mxu1 %v512_v0 }
  0x69   :  { %562 = vmatpush2.msra.mxu1 %v511_v19  ;;  %923 = vmatpush3.msra.mxu0 %v646_v20 }
  0x6a   :  { %563 = vmatprep.subr.mxu1 %v510_v21  ;;  %924 = vmatprep.subr.mxu0 %v661_v22 }
  0x6b   :  { %564 = vmatpush2.msra.mxu1 %v509_v23  ;;  %925 = vmatpush3.msra.mxu0 %v645_v24 }
  0x6c   :  { %565 = vmatprep.subr.mxu1 %v508_v25  ;;  %926 = vmatprep.subr.mxu0 %v660_v26 }
  0x6d   :  { %566 = vmatpush2.msra.mxu1 %v507_v27  ;;  %927 = vmatpush3.msra.mxu0 %v644_v28 }
  0x6e   :  { %310 = vmatmul.mubr.bf16.gmra.mxu0 %v999_v16  ;;  %567 = vmatprep.subr.mxu1 %v506_v29 }
  0x6f   :  { %928 = vmatprep.subr.mxu0 %v659_v30  ;;  %568 = vmatpush2.msra.mxu1 %v505_v31 }
  0x70   :  { %929 = vmatpush3.msra.mxu0 %v643_v32  ;;  %569 = vmatprep.subr.mxu1 %v504_v33 }
  0x71   :  { %930 = vmatprep.subr.mxu0 %v658_v34  ;;  %570 = vmatpush2.msra.mxu1 %v503_v35 }
  0x72   :  { %571 = vmatprep.subr.mxu1 %v502_v36  ;;  %931 = vmatpush3.msra.mxu0 %v642_v51 }
  0x73   :  { %572 = vmatpush2.msra.mxu1 %v501_v37  ;;  %932 = vmatprep.subr.mxu0 %v657_v53 }
  0x74   :  { %573 = vmatprep.subr.mxu1 %v500_v38  ;;  %933 = vmatpush3.msra.mxu0 %v641_v55 }
  0x75   :  { %574 = vmatpush2.msra.mxu1 %v499_v39  ;;  %934 = vmatprep.subr.mxu0 %v656_v57 }
  0x76   :  { %575 = vmatprep.subr.mxu1 %v498_v40  ;;  %935 = vmatpush3.msra.mxu0 %v640_v59 }
  0x77   :  { %576 = vmatpush2.msra.mxu1 %v497_v41 }
  0x78   :  { %577 = vmatprep.subr.mxu1 %v496_v42 }
  0x79   :  { %578 = vmatpush2.msra.mxu1 %v495_v43 }
  0x7a   :  { %579 = vmatprep.subr.mxu1 %v494_v44 }
  0x7b   :  { %580 = vmatpush2.msra.mxu1 %v493_v45 }
  0x7c   :  { %581 = vmatprep.subr.mxu1 %v492_v46 }
  0x7d   :  { %582 = vmatpush2.msra.mxu1 %v491_v47 }
  0x7e   :  { %583 = vmatprep.subr.mxu1 %v490_v48 }
  0x7f   :  { %584 = vmatpush2.msra.mxu1 %v489_v49 }
  0x80   :  { %585 = vmatprep.subr.mxu1 %v488_v50 }
  0x81   :  { %586 = vmatpush2.msra.mxu1 %v487_v52 }
  0x82   :  { %587 = vmatprep.subr.mxu1 %v486_v54 }
  0x83   :  { %588 = vmatpush2.msra.mxu1 %v485_v56  ;;  %v517_v56 = vlaneseq }
  0x84   :  { %589 = vmatprep.subr.mxu1 %v484_v58 }
  0x85   :  { %590 = vmatpush2.msra.mxu1 %v483_v60  ;;  %v1244_v58 = vshrl.u32 %v517_v56, 7 }
  0x86   :  { %592 = vmatmul.mubr.f32.vlgmr.msra.gmra.mxu1 %v435_v62  ;;  %v1252_v62 = vld [vmem:[%s1353_s6] sm:$0x3]  ;;  %s1133_s6 = smov [#allocation11]  }
  0x87   :  { %597 = vmatprep.mubr.f32.mxu1 %v438_v63  ;;  %v519_v60 = vsub.s32 0, %v1244_v58  ;;  %s870_s22 = sshll.u32 %s1133_s6, 4  ;;  %s871_s22 = int_to_ptr.vmem [resolvable:$true] %s870_s22 }
  0x88   :  { %s1096_s4 = scalar_lea.vmem %s871_s22, 1024  ;;  %p1101_p7 = scmp.lt.s32.totalorder %s871_s22, %s871_s22 }
  0x89   :  { %v1255_v63 = vrot.slane %v1252_v62, %v519_v60  ;;  %p1097_p6 = scmp.ne.s32.totalorder %s871_s22, %s1096_s4  ;;  %p1102_p8 = scmp.lt.s32.totalorder %s1096_s4, %s1096_s4 }
  0x8a   :  { %598 = vmatmul.mubr.f32.gmra.mxu1 %v437_v1 }
  0x8b   :  { %603 = vmatprep.mubr.f32.mxu1 %v440_v2  ;;  %p1103_p9 = por %p1102_p8, %p1101_p7 }
  0x8d   :  { %p1104_p10 = pnand %p1103_p9, %p1097_p6 }
  0x8e   :  { %604 = vmatmul.mubr.f32.gmra.mxu1 %v439_v3 }
  0x8f   :  { %609 = vmatprep.mubr.f32.mxu1 %v442_v4 }
  0x92   :  { %610 = vmatmul.mubr.f32.gmra.mxu1 %v441_v5 }
  0x93   :  { %615 = vmatprep.mubr.f32.mxu1 %v444_v6 }
  0x96   :  { %616 = vmatmul.mubr.f32.gmra.mxu1 %v443_v7 }
  0x97   :  { %621 = vmatprep.mubr.f32.mxu1 %v446_v8 }
  0x9a   :  { %622 = vmatmul.mubr.f32.gmra.mxu1 %v445_v9 }
  0x9b   :  { %627 = vmatprep.mubr.f32.mxu1 %v448_v10 }
  0x9e   :  { %628 = vmatmul.mubr.f32.gmra.mxu1 %v447_v11 }
  0x9f   :  { %633 = vmatprep.mubr.f32.mxu1 %v450_v12 }
  0xa2   :  { %634 = vmatmul.mubr.f32.gmra.mxu1 %v449_v13 }
  0xb2   :  { %v382_v14 = vpop.permute.xlu0 %381 }
  0xb4   :  { %v392_v22 = vpop.permute.xlu1 %391 }
  0xb6   :  { %v387_v19 = vpop.permute.xlu0 %386 }
  0xb8   :  { %v397_v29 = vpop.permute.xlu1 %396 }
  0xba   :  { %v402_v34 = vpop.permute.xlu0 %401 }
  0xbc   :  { %v407_v39 = vpop.permute.xlu1 %406 }
  0xbe   :  { %v412_v44 = vpop.permute.xlu0 %411 }
  0xc0   :  { %v417_v49 = vpop.permute.xlu1 %416 }
 0x116   :  { %v281_v15 = vpop.f32.mrf.mxu0 }
 0x117   :  { %v419_v18 = vmul.f32 %v382_v14, %v281_v15 }
 0x118   :  { %v283_v16 = vpop.f32.mrf.mxu0 }
 0x119   :  { %v420_v17 = vmul.f32 %v382_v14, %v283_v16 }
 0x11a   :  { %v285_v0 = vpop.f32.mrf.mxu0 }
 0x11b   :  { %736 = vmatprep.mubr.f32.mxu0 %v420_v17  ;;  %v421_v23 = vmul.f32 %v387_v19, %v285_v0 }
 0x11c   :  { %v287_v20 = vpop.f32.mrf.mxu0  ;;  %737 = vmatmul.mubr.f32.vlgmr.msra.gmra.mxu0 %v419_v18 }
 0x11d   :  { %v422_v21 = vmul.f32 %v387_v19, %v287_v20 }
 0x11e   :  { %v291_v24 = vpop.f32.mrf.mxu0 }
 0x11f   :  { %741 = vmatprep.mubr.f32.mxu0 %v422_v21  ;;  %v423_v27 = vmul.f32 %v392_v22, %v291_v24 }
 0x120   :  { %v293_v25 = vpop.f32.mrf.mxu0  ;;  %742 = vmatmul.mubr.f32.gmra.mxu0 %v421_v23 }
 0x121   :  { %v424_v26 = vmul.f32 %v392_v22, %v293_v25 }
 0x122   :  { %v295_v28 = vpop.f32.mrf.mxu0 }
 0x123   :  { %746 = vmatprep.mubr.f32.mxu0 %v424_v26  ;;  %v425_v32 = vmul.f32 %v397_v29, %v295_v28 }
 0x124   :  { %v297_v30 = vpop.f32.mrf.mxu0  ;;  %747 = vmatmul.mubr.f32.gmra.mxu0 %v423_v27 }
 0x125   :  { %v426_v31 = vmul.f32 %v397_v29, %v297_v30 }
 0x126   :  { %v301_v33 = vpop.f32.mrf.mxu0 }
 0x127   :  { %751 = vmatprep.mubr.f32.mxu0 %v426_v31  ;;  %v427_v37 = vmul.f32 %v402_v34, %v301_v33 }
 0x128   :  { %v303_v35 = vpop.f32.mrf.mxu0  ;;  %752 = vmatmul.mubr.f32.gmra.mxu0 %v425_v32 }
 0x129   :  { %v428_v36 = vmul.f32 %v402_v34, %v303_v35 }
 0x12a   :  { %v305_v38 = vpop.f32.mrf.mxu0 }
 0x12b   :  { %756 = vmatprep.mubr.f32.mxu0 %v428_v36  ;;  %v429_v42 = vmul.f32 %v407_v39, %v305_v38 }
 0x12c   :  { %v307_v40 = vpop.f32.mrf.mxu0  ;;  %757 = vmatmul.mubr.f32.gmra.mxu0 %v427_v37 }
 0x12d   :  { %v430_v41 = vmul.f32 %v407_v39, %v307_v40 }
 0x12e   :  { %v311_v43 = vpop.f32.mrf.mxu0 }
 0x12f   :  { %761 = vmatprep.mubr.f32.mxu0 %v430_v41  ;;  %v431_v47 = vmul.f32 %v412_v44, %v311_v43 }
 0x130   :  { %v313_v45 = vpop.f32.mrf.mxu0  ;;  %762 = vmatmul.mubr.f32.gmra.mxu0 %v429_v42 }
 0x131   :  { %v432_v46 = vmul.f32 %v412_v44, %v313_v45 }
 0x132   :  { %v315_v48 = vpop.f32.mrf.mxu0 }
 0x133   :  { %766 = vmatprep.mubr.f32.mxu0 %v432_v46  ;;  %v433_v52 = vmul.f32 %v417_v49, %v315_v48 }
 0x134   :  { %v317_v50 = vpop.f32.mrf.mxu0  ;;  %767 = vmatmul.mubr.f32.gmra.mxu0 %v431_v47 }
 0x135   :  { %v434_v51 = vmul.f32 %v417_v49, %v317_v50 }
 0x137   :  { %771 = vmatprep.mubr.f32.mxu0 %v434_v51 }
 0x138   :  { %772 = vmatmul.mubr.f32.gmra.mxu0 %v433_v52 }
 0x146   :  { %v593_v53 = vpop.f32.mrf.mxu1 }
 0x147   :  { %v594_v3 = vadd.f32 %v593_v53, %v1255_v63 }
 0x148   :  { %v1240_v54 = vpop.f32.mrf.mxu1 }
 0x14a   :  { %v599_v55 = vpop.f32.mrf.mxu1 }
 0x14b   :  { %v600_v9 = vadd.f32 %v599_v55, %v1255_v63  ;;  %v523_v55 = vsub.s32 1, %v1244_v58 }
 0x14c   :  { %v1242_v57 = vpop.f32.mrf.mxu1 }
 0x14e   :  { %v605_v59 = vpop.f32.mrf.mxu1 }
 0x14f   :  { %v606_v17 = vadd.f32 %v605_v59, %v1255_v63 }
 0x150   :  { %v1247_v61 = vpop.f32.mrf.mxu1 }
 0x152   :  { %v611_v1 = vpop.f32.mrf.mxu1 }
 0x153   :  { %v612_v27 = vadd.f32 %v611_v1, %v1255_v63 }
 0x154   :  { %v1258_v4 = vpop.f32.mrf.mxu1 }
 0x156   :  { %v617_v10 = vpop.f32.mrf.mxu1 }
 0x157   :  { %v618_v36 = vadd.f32 %v617_v10, %v1255_v63 }
 0x158   :  { %v1268_v18 = vpop.f32.mrf.mxu1 }
 0x15a   :  { %v623_v26 = vpop.f32.mrf.mxu1 }
 0x15b   :  { %v624_v47 = vadd.f32 %v623_v26, %v1255_v63 }
 0x15c   :  { %v1282_v37 = vpop.f32.mrf.mxu1 }
 0x15e   :  { %v629_v48 = vpop.f32.mrf.mxu1 }
 0x1dc   :  { %v936_v2 = vpop.f32.mrf.mxu0 }
 0x1de   :  { %v937_v5 = vpop.f32.mrf.mxu0 }
 0x1df   :  { %v938_v6 = vadd.f32 %v937_v5, %v936_v2  ;;  %v630_v2 = vadd.f32 %v629_v48, %v1255_v63 }
 0x1e0   :  { %v939_v7 = vpop.f32.mrf.mxu0 }
 0x1e1   :  { %v1260_v8 = vadd.f32 %v938_v6, %v594_v3  ;;  %v1300_v3 = vpop.f32.mrf.mxu1 }
 0x1e2   :  { %v940_v11 = vpop.f32.mrf.mxu0 }
 0x1e3   :  { %v785_v12 = vmul.f32 0.044715, %v1260_v8  ;;  %v941_v13 = vadd.f32 %v940_v11, %v939_v7 }
 0x1e4   :  { %v942_v14 = vpop.f32.mrf.mxu0 }
 0x1e5   :  { %v793_v15 = vmul.f32 %v785_v12, %v1260_v8  ;;  %v1265_v16 = vadd.f32 %v941_v13, %v600_v9  ;;  %v1306_v12 = vrot.slane %v1252_v62, %v523_v55 }
 0x1e6   :  { %v943_v0 = vpop.f32.mrf.mxu0 }
 0x1e7   :  { %v801_v19 = vmul.f32 %v793_v15, %v1260_v8  ;;  %v786_v20 = vmul.f32 0.044715, %v1265_v16  ;;  %v944_v21 = vadd.f32 %v943_v0, %v942_v14  ;;  %v608_v48 = vadd.f32 %v1247_v61, %v1306_v12 }
 0x1e8   :  { %v945_v22 = vpop.f32.mrf.mxu0 }
 0x1e9   :  { %v809_v23 = vadd.f32 %v801_v19, %v1260_v8  ;;  %v794_v24 = vmul.f32 %v786_v20, %v1265_v16  ;;  %v1274_v25 = vadd.f32 %v944_v21, %v606_v17  ;;  %v635_v17 = vpop.f32.mrf.mxu1  ;;  %v777_v21 = vmul.f32 0.5, %v1260_v8 }
 0x1ea   :  { %v946_v28 = vpop.f32.mrf.mxu0  ;;  %v636_v19 = vadd.f32 %v635_v17, %v1255_v63  ;;  %v778_v8 = vmul.f32 0.5, %v1265_v16 }
 0x1eb   :  { %v817_v29 = vmul.f32 0.7978846, %v809_v23  ;;  %v802_v30 = vmul.f32 %v794_v24, %v1265_v16  ;;  %v787_v31 = vmul.f32 0.044715, %v1274_v25  ;;  %v947_v32 = vadd.f32 %v946_v28, %v945_v22 }
 0x1ec   :  { %v948_v33 = vpop.f32.mrf.mxu0 }
 0x1ed   :  { %1000 = vtanh.f32 %v817_v29  ;;  %v810_v34 = vadd.f32 %v802_v30, %v1265_v16  ;;  %v795_v35 = vmul.f32 %v787_v31, %v1274_v25  ;;  %v1284_v38 = vadd.f32 %v947_v32, %v612_v27 }
 0x1ee   :  { %v949_v39 = vpop.f32.mrf.mxu0  ;;  %v596_v27 = vadd.f32 %v1240_v54, %v1306_v12  ;;  %v602_v54 = vadd.f32 %v1242_v57, %v1306_v12 }
 0x1ef   :  { %v818_v40 = vmul.f32 0.7978846, %v810_v34  ;;  %v803_v41 = vmul.f32 %v795_v35, %v1274_v25  ;;  %v950_v42 = vadd.f32 %v949_v39, %v948_v33  ;;  %v788_v43 = vmul.f32 0.044715, %v1284_v38 }
 0x1f0   :  { %v951_v44 = vpop.f32.mrf.mxu0 }
 0x1f1   :  { %1002 = vtanh.f32 %v818_v40  ;;  %v811_v45 = vadd.f32 %v803_v41, %v1274_v25  ;;  %v1289_v46 = vadd.f32 %v950_v42, %v618_v36  ;;  %v796_v49 = vmul.f32 %v788_v43, %v1284_v38 }
 0x1f2   :  { %v952_v50 = vpop.f32.mrf.mxu0 }
 0x1f3   :  { %v819_v51 = vmul.f32 0.7978846, %v811_v45  ;;  %v789_v52 = vmul.f32 0.044715, %v1289_v46  ;;  %v953_v53 = vadd.f32 %v952_v50, %v951_v44  ;;  %v804_v56 = vmul.f32 %v796_v49, %v1284_v38 }
 0x1f4   :  { %v954_v59 = vpop.f32.mrf.mxu0  ;;  %v779_v44 = vmul.f32 0.5, %v1274_v25  ;;  %v614_v25 = vadd.f32 %v1258_v4, %v1306_v12  ;;  %v626_v4 = vadd.f32 %v1282_v37, %v1306_v12 }
 0x1f5   :  { %1004 = vtanh.f32 %v819_v51  ;;  %v797_v60 = vmul.f32 %v789_v52, %v1289_v46  ;;  %v1297_v1 = vadd.f32 %v953_v53, %v624_v47  ;;  %v812_v5 = vadd.f32 %v804_v56, %v1284_v38 }
 0x1f6   :  { %v955_v6 = vpop.f32.mrf.mxu0  ;;  %v780_v52 = vmul.f32 0.5, %v1284_v38 }
 0x1f7   :  { %v805_v7 = vmul.f32 %v797_v60, %v1289_v46  ;;  %v790_v9 = vmul.f32 0.044715, %v1297_v1  ;;  %v956_v58 = vadd.f32 %v955_v6, %v954_v59  ;;  %v820_v10 = vmul.f32 0.7978846, %v812_v5 }
 0x1f8   :  { %v957_v11 = vpop.f32.mrf.mxu0  ;;  %v781_v60 = vmul.f32 0.5, %v1289_v46  ;;  %v620_v5 = vadd.f32 %v1268_v18, %v1306_v12  ;;  %v632_v18 = vadd.f32 %v1300_v3, %v1306_v12 }
 0x1f9   :  { %v813_v13 = vadd.f32 %v805_v7, %v1289_v46  ;;  %v798_v14 = vmul.f32 %v790_v9, %v1297_v1  ;;  %v1310_v15 = vadd.f32 %v956_v58, %v630_v2  ;;  %1006 = vtanh.f32 %v820_v10 }
 0x1fa   :  { %v1001_v0 = vpop.eup %1000  ;;  %v958_v20 = vpop.f32.mrf.mxu0  ;;  %v782_v9 = vmul.f32 0.5, %v1297_v1 }
 0x1fb   :  { %v833_v22 = vadd.f32 1.0, %v1001_v0  ;;  %v821_v23 = vmul.f32 0.7978846, %v813_v13  ;;  %v806_v24 = vmul.f32 %v798_v14, %v1297_v1  ;;  %v791_v62 = vmul.f32 0.044715, %v1310_v15 }
 0x1fc   :  { %v959_v26 = vadd.f32 %v958_v20, %v957_v11  ;;  %v783_v46 = vmul.f32 0.5, %v1310_v15 }
 0x1fd   :  { %v841_v28 = vmul.f32 %v833_v22, %v777_v21  ;;  %1008 = vtanh.f32 %v821_v23  ;;  %v814_v29 = vadd.f32 %v806_v24, %v1297_v1  ;;  %v799_v63 = vmul.f32 %v791_v62, %v1310_v15 }
 0x1fe   :  { %v1003_v30 = vpop.eup %1002  ;;  %v774_v31 = vadd.f32 %v959_v26, %v636_v19  ;;  %v637_v19 = vpop.f32.mrf.mxu1 }
 0x1ff   :  { %v849_v32 = vadd.f32 %v841_v28, %v596_v27  ;;  %v834_v33 = vadd.f32 1.0, %v1003_v30  ;;  %v822_v34 = vmul.f32 0.7978846, %v814_v29  ;;  %v807_v35 = vmul.f32 %v799_v63, %v1310_v15 }
 0x200   :  { %v792_v36 = vmul.f32 0.044715, %v774_v31  ;;  %v784_v1 = vmul.f32 0.5, %v774_v31  ;;  %v638_v37 = vadd.f32 %v637_v19, %v1306_v12 }
 0x201   :  { %857 = vst [vmem:[#allocation11] sm:$0xff] %v849_v32  ;;  %v842_v39 = vmul.f32 %v834_v33, %v778_v8  ;;  %1010 = vtanh.f32 %v822_v34  ;;  %v815_v41 = vadd.f32 %v807_v35, %v1310_v15 }
 0x202   :  { %v1005_v40 = vpop.eup %1004  ;;  %v800_v42 = vmul.f32 %v792_v36, %v774_v31 }
 0x203   :  { %v850_v43 = vadd.f32 %v842_v39, %v602_v54  ;;  %v835_v45 = vadd.f32 1.0, %v1005_v40  ;;  %v823_v16 = vmul.f32 0.7978846, %v815_v41 }
 0x204   :  { %v808_v47 = vmul.f32 %v800_v42, %v774_v31 }
 0x205   :  { %858 = vst [vmem:[#allocation11 + $0x8] sm:$0xff] %v850_v43  ;;  %v843_v49 = vmul.f32 %v835_v45, %v779_v44  ;;  %1012 = vtanh.f32 %v823_v16 }
 0x206   :  { %v816_v50 = vadd.f32 %v808_v47, %v774_v31  ;;  %v1007_v57 = vpop.eup %1006 }
 0x207   :  { %v851_v51 = vadd.f32 %v843_v49, %v608_v48  ;;  %v836_v53 = vadd.f32 1.0, %v1007_v57 }
 0x208   :  { %v824_v55 = vmul.f32 0.7978846, %v816_v50 }
 0x209   :  { %859 = vst [vmem:[#allocation11 + $0x10] sm:$0xff] %v851_v51  ;;  %v844_v59 = vmul.f32 %v836_v53, %v780_v52 }
 0x20a   :  { %v1009_v56 = vpop.eup %1008  ;;  %1014 = vtanh.f32 %v824_v55 }
 0x20b   :  { %v837_v2 = vadd.f32 1.0, %v1009_v56  ;;  %v852_v61 = vadd.f32 %v844_v59, %v614_v25 }
 0x20d   :  { %v845_v6 = vmul.f32 %v837_v2, %v781_v60  ;;  %860 = vst [vmem:[#allocation11 + $0x18] sm:$0xff] %v852_v61 }
 0x20e   :  { %v1011_v7 = vpop.eup %1010 }
 0x20f   :  { %v853_v38 = vadd.f32 %v845_v6, %v620_v5  ;;  %v838_v58 = vadd.f32 1.0, %v1011_v7 }
 0x211   :  { %861 = vst [vmem:[#allocation11 + $0x20] sm:$0xff] %v853_v38  ;;  %v846_v10 = vmul.f32 %v838_v58, %v782_v9 }
 0x212   :  { %v1013_v11 = vpop.eup %1012 }
 0x213   :  { %v854_v13 = vadd.f32 %v846_v10, %v626_v4  ;;  %v839_v14 = vadd.f32 1.0, %v1013_v11 }
 0x215   :  { %862 = vst [vmem:[#allocation11 + $0x28] sm:$0xff] %v854_v13  ;;  %v847_v17 = vmul.f32 %v839_v14, %v783_v46 }
 0x217   :  { %v1015_v0 = vpop.eup %1014  ;;  %v855_v20 = vadd.f32 %v847_v17, %v632_v18 }
 0x218   :  { %v840_v21 = vadd.f32 1.0, %v1015_v0 }
 0x219   :  { %863 = vst [vmem:[#allocation11 + $0x30] sm:$0xff] %v855_v20 }
 0x21a   :  { %v848_v22 = vmul.f32 %v840_v21, %v784_v1 }
 0x21c   :  { %v856_v23 = vadd.f32 %v848_v22, %v638_v37 }
 0x21e   :  { %864 = vst [vmem:[#allocation11 + $0x38] sm:$0xff] %v856_v23 }
 0x21f   :  { %1107 = shalt.err (!%p1104_p10)
}
 0x220   :  { %876 = dma.vmem_to_hbm [thread:$0]  %s871_s22, 1024, %s1354_s7, [#allocation5], %s1128_s11, %s1128_s11, %s1129_s12  }
 0x221   :  { %1122 = dma.done.wait [#allocation5], 1024  }
 0x222   :  { %1123 = vsyncadd [#allocation5], 4294966272 }
 0x223   :  { %880 = vsyncpa [#allocation4], 1 }
 0x224   :  { %881 = vsyncpa [#allocation7], 1 }
 0x225   :  { %882 = vsyncpa [#allocation10], 1 }
 0x226   :  { %883 = vsyncpa [#allocation5], 1 }

</bundles_post_ra>
